<compile_context>
chip_gen: v6e
topology: v6e:2x2x1
jax: 0.10.0
libtpu: 0.0.40
codegen_flags: <defaults>
</compile_context>

<pallas_src>
import functools

import jax
import jax.numpy as jnp
from jax.experimental import pallas as pl
from jax.experimental.pallas import tpu as pltpu

KERNEL_SIZES = (3, 5, 7)
STRIDE = 2  # the space-to-depth fusion below assumes the module's default stride of 2


def _round_up(x, m):
    return (x + m - 1) // m * m


def _cdiv(a, b):
    return -(-a // b)


# ----------------------------- Pallas kernel (hot path) -----------------------------
def _make_shifted_matmul_kernel(tm, wr, n_tap):
    """One grid step produces output rows [j*tm, (j+1)*tm) of one image:

        out[m, :] = sum_sy  xw[m + sy*Wr, :] @ W[sy]  + bias

    Each height tap is a contiguous, constant-offset slice of the VMEM-resident input rows.
    """
    def kernel(xw_ref, w_ref, b_ref, o_ref):
        base = pl.program_id(1) * tm
        acc = None
        for sy in range(n_tap):                         # static unroll: n_tap MXU matmuls
            start = pl.multiple_of(base + sy * wr, 8)
            rows = xw_ref[pl.ds(start, tm), :]          # (tm, K1) contiguous VMEM read
            part = jnp.dot(rows, w_ref[sy], preferred_element_type=jnp.float32)
            acc = part if acc is None else acc + part
        o_ref[...] = (acc + b_ref[...]).astype(o_ref.dtype)
    return kernel


def _pallas_shifted_matmul(xwf, w_taps, bias_row, *, tm, n_tiles, wr, m_pad, out_dtype):
    N, R, K1 = xwf.shape
    n_tap, _, Cop = w_taps.shape
    in_bytes = jnp.dtype(xwf.dtype).itemsize
    out_bytes = jnp.dtype(out_dtype).itemsize
    flops = 2 * N * m_pad * K1 * Cop * n_tap
    bytes_accessed = (N * R * K1 * in_bytes + n_tap * K1 * Cop * in_bytes
                      + Cop * 4 + N * m_pad * Cop * out_bytes)
    return pl.pallas_call(
        _make_shifted_matmul_kernel(tm, wr, n_tap),
        out_shape=jax.ShapeDtypeStruct((N, m_pad, Cop), out_dtype),
        grid=(N, n_tiles),
        in_specs=[
            # Per-image rows: index_map is constant along the tile axis, so the block is
            # DMA'd once per image and stays VMEM-resident while all its tiles are produced.
            pl.BlockSpec((None, R, K1), lambda n, j: (n, 0, 0)),
            pl.BlockSpec((n_tap, K1, Cop), lambda n, j: (0, 0, 0)),   # resident weights
            pl.BlockSpec((1, Cop), lambda n, j: (0, 0)),              # resident bias (f32)
        ],
        out_specs=pl.BlockSpec((None, tm, Cop), lambda n, j: (n, j, 0)),
        compiler_params=pltpu.CompilerParams(
            dimension_semantics=("parallel", "parallel"),  # v7x: TCs split batch or tiles
            vmem_limit_bytes=48 * 1024 * 1024,             # budgeted for v7x's 64 MiB per TC
        ),
        cost_estimate=pl.CostEstimate(flops=int(flops), transcendentals=0,
                                      bytes_accessed=int(bytes_accessed)),
    )(xwf, w_taps, bias_row)


# ------------------------------- XLA-side glue (cheap) -------------------------------
def _prepare_rows(x_nhwc, *, pad, n_tap, Ho, Wo, Wr, m_pad, compute_dtype):
    """pad -> space-to-depth(2) -> fold width taps into channels -> flatten rows.

    Returns (N, R, K1) with K1 = n_tap*4*C and R = m_pad + (n_tap-1)*Wr, laid out so that
    flattened output row m = oy*Wr + ox only needs input rows m + sy*Wr, sy = 0..n_tap-1.
    Size ~ n_tap x the input -- far below a full 7x7 im2col and below the output bytes.
    """
    N, H, W, C = x_nhwc.shape
    Hs = Ho + n_tap - 1                  # space-to-depth rows needed (incl. height halo)
    Wsc = Wr + n_tap - 1                 # space-to-depth cols needed (incl. width halo)
    xp = jnp.pad(x_nhwc, ((0, 0),
                          (pad, 2 * Hs - H - pad),
                          (pad, 2 * Wsc - W - pad),
                          (0, 0)))
    # space-to-depth: (r, s) = (2a+by, 2b+bx); channel layout (by, bx, c)
    xs = xp.reshape(N, Hs, 2, Wsc, 2, C).transpose(0, 1, 3, 2, 4, 5).reshape(N, Hs, Wsc, 4 * C)
    # fold the width taps sx into channels: layout (sx, by, bx, c)
    xw = jnp.concatenate([xs[:, :, sx:sx + Wr, :] for sx in range(n_tap)], axis=-1)
    K1 = n_tap * 4 * C
    xwf = xw.reshape(N, Hs * Wr, K1)
    R = m_pad + (n_tap - 1) * Wr
    if R > Hs * Wr:                      # zero rows so padded output tiles read in-bounds
        xwf = jnp.pad(xwf, ((0, 0), (0, R - Hs * Wr), (0, 0)))
    return xwf.astype(compute_dtype)


def _build_tap_weights(ws, bs, k_max, n_tap):
    """Zero-embed every branch into the centered k_max x k_max window (concat column order),
    then regroup into per-height-tap matrices W[sy] of shape (n_tap*4*C, dim_out) matching the
    space-to-depth + width-fold input channel layout (sx, by, bx, c)."""
    C = int(ws[0].shape[1])
    dim_out = sum(int(w.shape[0]) for w in ws)
    k_even = 2 * n_tap
    w_full = jnp.zeros((k_even, k_even, C, dim_out), jnp.float32)
    bias = jnp.zeros((dim_out,), jnp.float32)
    col = 0
    for w, b in zip(ws, bs):
        dsc, _, k, _ = (int(s) for s in w.shape)
        off = (k_max - k) // 2   # branch k (pad (k-2)//2) is the centered sub-window of k_max
        w_t = jnp.transpose(w, (2, 3, 1, 0)).astype(jnp.float32)      # (k, k, C, dsc)
        w_full = w_full.at[off:off + k, off:off + k, :, col:col + dsc].set(w_t)
        bias = bias.at[col:col + dsc].set(b.astype(jnp.float32))
        col += dsc
    # (dy, dx, C, O) -> (sy, by, sx, bx, C, O) -> (sy, sx, by, bx, C, O) -> (sy, K1, O)
    w_taps = w_full.reshape(n_tap, 2, n_tap, 2, C, dim_out).transpose(0, 2, 1, 3, 4, 5)
    w_taps = w_taps.reshape(n_tap, n_tap * 4 * C, dim_out)
    return w_taps, bias, dim_out


# --------------------------------- CrossEmbedLayer ----------------------------------
def make_cross_embed_params(key, dim_in, dim_out, kernel_sizes):
    kernel_sizes = sorted(kernel_sizes)
    num_scales = len(kernel_sizes)
    dim_scales = [int(dim_out / 2 ** i) for i in range(1, num_scales)]
    dim_scales = [*dim_scales, dim_out - sum(dim_scales)]
    params = []
    for i, (k, dscale) in enumerate(zip(kernel_sizes, dim_scales)):
        wkey = jax.random.fold_in(key, 2 * i)
        bkey = jax.random.fold_in(key, 2 * i + 1)
        fan_in = dim_in * k * k
        bound = 1.0 / (fan_in ** 0.5)
        w = jax.random.uniform(wkey, (dscale, dim_in, k, k), jnp.float32, -bound, bound)
        b = jax.random.uniform(bkey, (dscale,), jnp.float32, -bound, bound)
        params.append({"w": w, "b": b, "k": k, "pad": (k - STRIDE) // 2})
    return params


@functools.partial(jax.jit, static_argnames=("compute_dtype",))
def cross_embed_forward(x_nchw, wb, compute_dtype=jnp.bfloat16):
    """wb: tuple of (w, b) pairs in sorted-kernel order.  NCHW in -> NCHW out.

    compute_dtype=bf16 (deliberate weight/activation down-cast) halves HBM traffic and runs the
    MXU at native rate; accumulation stays f32.  Pass jnp.float32 for a bit-faithful path.
    """
    N, C, H, W = x_nchw.shape
    ws = [w for (w, _) in wb]
    bs = [b for (_, b) in wb]
    k_max = max(int(w.shape[2]) for w in ws)
    n_tap = _cdiv(k_max, STRIDE)               # height/width taps after space-to-depth (=4)
    pad = (k_max - STRIDE) // 2
    Ho = (H + 2 * pad - k_max) // STRIDE + 1
    Wo = (W + 2 * pad - k_max) // STRIDE + 1
    Wr = _round_up(Wo, 8)                      # flattened row pitch (extra cols dropped later)
    m_img = Ho * Wr
    n_tiles = max(1, _cdiv(m_img, 1024))       # ~1024-row output tiles, balanced tile count
    tm = _round_up(_cdiv(m_img, n_tiles), 8)
    m_pad = n_tiles * tm

    w_taps, bias, dim_out = _build_tap_weights(ws, bs, k_max, n_tap)
    Cop = _round_up(dim_out, 128)              # lane-dense output (real stems have >=128)
    w_taps = jnp.pad(w_taps, ((0, 0), (0, 0), (0, Cop - dim_out))).astype(compute_dtype)
    bias_row = jnp.pad(bias, (0, Cop - dim_out)).reshape(1, Cop)     # kept f32 (exact)

    x_nhwc = jnp.transpose(x_nchw, (0, 2, 3, 1))      # boundary transpose (module is NCHW)
    xwf = _prepare_rows(x_nhwc, pad=pad, n_tap=n_tap, Ho=Ho, Wo=Wo, Wr=Wr,
                        m_pad=m_pad, compute_dtype=compute_dtype)

    out = _pallas_shifted_matmul(xwf, w_taps, bias_row, tm=tm, n_tiles=n_tiles,
                                 wr=Wr, m_pad=m_pad, out_dtype=x_nchw.dtype)
    out = out[:, :m_img, :].reshape(N, Ho, Wr, Cop)[:, :, :Wo, :dim_out]
    return jnp.transpose(out, (0, 3, 1, 2))           # boundary transpose back to NCHW


# ------------------------------- reference (check) ----------------------------------
def _ref_forward(x_nchw, params):
    outs = []
    for p in params:
        o = jax.lax.conv_general_dilated(
            x_nchw, p["w"], window_strides=(STRIDE, STRIDE),
            padding=[(p["pad"], p["pad"]), (p["pad"], p["pad"])],
            dimension_numbers=("NCHW", "OIHW", "NCHW"))
        outs.append(o + p["b"][None, :, None, None])
    return jnp.concatenate(outs, axis=1)


if __name__ == "__main__":
    key = jax.random.PRNGKey(0)
    dim_in, dim_out = 4, 8
    N, H, W = 2, 16, 16

    xkey, pkey = jax.random.split(key)
    x = jax.random.normal(xkey, (N, dim_in, H, W), jnp.float32)
    params = make_cross_embed_params(pkey, dim_in, dim_out, KERNEL_SIZES)
    wb = tuple((p["w"], p["b"]) for p in params)

    out = jax.block_until_ready(cross_embed_forward(x, wb))   # bf16 operands, f32 accumulation

    ref = jax.block_until_ready(_ref_forward(x, params))      # f32 lax.conv ground truth
    assert out.shape == ref.shape, (out.shape, ref.shape)
    # bf16 operand rounding over K=49*C terms gives ~1e-3-level deviation; 2e-2 leaves >10x
    # margin while still catching any structural (tap/offset/layout) bug, which would be O(1).
    assert jnp.allclose(out, ref, rtol=2e-2, atol=2e-2), "mismatch vs lax.conv reference"

    print("KERNEL_OK")
</pallas_src>

<mosaic_0001>
module attributes {stable_mosaic.version = 11 : i64} {
  func.func @kernel(%arg0: i32, %arg1: i32, %arg2: memref<1x80x64xbf16, #tpu.memory_space<vmem>>, %arg3: memref<4x64x128xbf16, #tpu.memory_space<vmem>>, %arg4: memref<1x128xf32, #tpu.memory_space<vmem>>, %arg5: memref<1x56x128xf32, #tpu.memory_space<vmem>>) attributes {dimension_semantics = [#tpu.dimension_semantics<parallel>, #tpu.dimension_semantics<parallel>], iteration_bounds = array<i64: 2, 1>, scalar_prefetch = 0 : i64, scratch_operands = 0 : i64, tpu.core_type = #tpu.core_type<tc>, window_params = [{transform_indices = @transform_0, window_bounds = array<i64: 1, 80, 64>}, {pipeline_mode = #tpu.pipeline_mode<synchronous>, transform_indices = @transform_1, window_bounds = array<i64: 4, 64, 128>}, {pipeline_mode = #tpu.pipeline_mode<synchronous>, transform_indices = @transform_2, window_bounds = array<i64: 1, 128>}, {transform_indices = @transform_3, window_bounds = array<i64: 1, 56, 128>}]} {
    %c56_i32 = arith.constant 56 : i32
    %0 = arith.muli %arg1, %c56_i32 : i32
    %c0_i32 = arith.constant 0 : i32
    %1 = arith.addi %0, %c0_i32 : i32
    %2 = tpu.assume_multiple %1, 8 : i32
    %c0 = arith.constant 0 : index
    %3 = arith.index_cast %2 : i32 to index
    %c0_0 = arith.constant 0 : index
    %4 = vector.load %arg2[%c0, %3, %c0_0] : memref<1x80x64xbf16, #tpu.memory_space<vmem>>, vector<1x56x64xbf16>
    %5 = vector.shape_cast %4 : vector<1x56x64xbf16> to vector<56x64xbf16>
    %c0_1 = arith.constant 0 : index
    %c0_2 = arith.constant 0 : index
    %c0_3 = arith.constant 0 : index
    %6 = vector.load %arg3[%c0_1, %c0_2, %c0_3] : memref<4x64x128xbf16, #tpu.memory_space<vmem>>, vector<1x64x128xbf16>
    %7 = vector.shape_cast %6 : vector<1x64x128xbf16> to vector<64x128xbf16>
    %cst = arith.constant dense<0.000000e+00> : vector<56x128xf32>
    %8 = tpu.matmul %5, %7, %cst {dimension_numbers = #tpu.dot_dimension_numbers<[1], [0], [0], [1], [0, 0, 1, 1], [], []>} : vector<56x64xbf16>, vector<64x128xbf16>, vector<56x128xf32> -> vector<56x128xf32>
    %c8_i32 = arith.constant 8 : i32
    %9 = arith.addi %0, %c8_i32 : i32
    %10 = tpu.assume_multiple %9, 8 : i32
    %c0_4 = arith.constant 0 : index
    %11 = arith.index_cast %10 : i32 to index
    %c0_5 = arith.constant 0 : index
    %12 = vector.load %arg2[%c0_4, %11, %c0_5] : memref<1x80x64xbf16, #tpu.memory_space<vmem>>, vector<1x56x64xbf16>
    %13 = vector.shape_cast %12 : vector<1x56x64xbf16> to vector<56x64xbf16>
    %c1 = arith.constant 1 : index
    %c0_6 = arith.constant 0 : index
    %c0_7 = arith.constant 0 : index
    %14 = vector.load %arg3[%c1, %c0_6, %c0_7] : memref<4x64x128xbf16, #tpu.memory_space<vmem>>, vector<1x64x128xbf16>
    %15 = vector.shape_cast %14 : vector<1x64x128xbf16> to vector<64x128xbf16>
    %cst_8 = arith.constant dense<0.000000e+00> : vector<56x128xf32>
    %16 = tpu.matmul %13, %15, %cst_8 {dimension_numbers = #tpu.dot_dimension_numbers<[1], [0], [0], [1], [0, 0, 1, 1], [], []>} : vector<56x64xbf16>, vector<64x128xbf16>, vector<56x128xf32> -> vector<56x128xf32>
    %17 = arith.addf %8, %16 : vector<56x128xf32>
    %c16_i32 = arith.constant 16 : i32
    %18 = arith.addi %0, %c16_i32 : i32
    %19 = tpu.assume_multiple %18, 8 : i32
    %c0_9 = arith.constant 0 : index
    %20 = arith.index_cast %19 : i32 to index
    %c0_10 = arith.constant 0 : index
    %21 = vector.load %arg2[%c0_9, %20, %c0_10] : memref<1x80x64xbf16, #tpu.memory_space<vmem>>, vector<1x56x64xbf16>
    %22 = vector.shape_cast %21 : vector<1x56x64xbf16> to vector<56x64xbf16>
    %c2 = arith.constant 2 : index
    %c0_11 = arith.constant 0 : index
    %c0_12 = arith.constant 0 : index
    %23 = vector.load %arg3[%c2, %c0_11, %c0_12] : memref<4x64x128xbf16, #tpu.memory_space<vmem>>, vector<1x64x128xbf16>
    %24 = vector.shape_cast %23 : vector<1x64x128xbf16> to vector<64x128xbf16>
    %cst_13 = arith.constant dense<0.000000e+00> : vector<56x128xf32>
    %25 = tpu.matmul %22, %24, %cst_13 {dimension_numbers = #tpu.dot_dimension_numbers<[1], [0], [0], [1], [0, 0, 1, 1], [], []>} : vector<56x64xbf16>, vector<64x128xbf16>, vector<56x128xf32> -> vector<56x128xf32>
    %26 = arith.addf %17, %25 : vector<56x128xf32>
    %c24_i32 = arith.constant 24 : i32
    %27 = arith.addi %0, %c24_i32 : i32
    %28 = tpu.assume_multiple %27, 8 : i32
    %c0_14 = arith.constant 0 : index
    %29 = arith.index_cast %28 : i32 to index
    %c0_15 = arith.constant 0 : index
    %30 = vector.load %arg2[%c0_14, %29, %c0_15] : memref<1x80x64xbf16, #tpu.memory_space<vmem>>, vector<1x56x64xbf16>
    %31 = vector.shape_cast %30 : vector<1x56x64xbf16> to vector<56x64xbf16>
    %c3 = arith.constant 3 : index
    %c0_16 = arith.constant 0 : index
    %c0_17 = arith.constant 0 : index
    %32 = vector.load %arg3[%c3, %c0_16, %c0_17] : memref<4x64x128xbf16, #tpu.memory_space<vmem>>, vector<1x64x128xbf16>
    %33 = vector.shape_cast %32 : vector<1x64x128xbf16> to vector<64x128xbf16>
    %cst_18 = arith.constant dense<0.000000e+00> : vector<56x128xf32>
    %34 = tpu.matmul %31, %33, %cst_18 {dimension_numbers = #tpu.dot_dimension_numbers<[1], [0], [0], [1], [0, 0, 1, 1], [], []>} : vector<56x64xbf16>, vector<64x128xbf16>, vector<56x128xf32> -> vector<56x128xf32>
    %35 = arith.addf %26, %34 : vector<56x128xf32>
    %c0_19 = arith.constant 0 : index
    %c0_20 = arith.constant 0 : index
    %36 = vector.load %arg4[%c0_19, %c0_20] : memref<1x128xf32, #tpu.memory_space<vmem>>, vector<1x128xf32>
    %37 = vector.broadcast %36 : vector<1x128xf32> to vector<56x128xf32>
    %38 = arith.addf %35, %37 : vector<56x128xf32>
    %c0_21 = arith.constant 0 : index
    %c0_22 = arith.constant 0 : index
    %c0_23 = arith.constant 0 : index
    %39 = vector.load %arg5[%c0_21, %c0_22, %c0_23] : memref<1x56x128xf32, #tpu.memory_space<vmem>>, vector<1x56x128xf32>
    %40 = vector.shape_cast %39 : vector<1x56x128xf32> to vector<56x128xf32>
    %41 = vector.shape_cast %38 : vector<56x128xf32> to vector<1x56x128xf32>
    tpu.vector_store %arg5[%c0_21, %c0_22, %c0_23], %41 {strides = array<i32>} : memref<1x56x128xf32, #tpu.memory_space<vmem>>, vector<1x56x128xf32>,
    return
  }
  func.func @transform_0(%arg0: i32, %arg1: i32) -> (i32, i32, i32) {
    %c0_i32 = arith.constant 0 : i32
    %c0_i32_0 = arith.constant 0 : i32
    %c0_i32_1 = arith.constant 0 : i32
    return %arg0, %c0_i32, %c0_i32_0 : i32, i32, i32
  }
  func.func @transform_1(%arg0: i32, %arg1: i32) -> (i32, i32, i32) {
    %c0_i32 = arith.constant 0 : i32
    %c0_i32_0 = arith.constant 0 : i32
    %c0_i32_1 = arith.constant 0 : i32
    %c0_i32_2 = arith.constant 0 : i32
    return %c0_i32, %c0_i32_0, %c0_i32_1 : i32, i32, i32
  }
  func.func @transform_2(%arg0: i32, %arg1: i32) -> (i32, i32) {
    %c0_i32 = arith.constant 0 : i32
    %c0_i32_0 = arith.constant 0 : i32
    %c0_i32_1 = arith.constant 0 : i32
    return %c0_i32, %c0_i32_0 : i32, i32
  }
  func.func @transform_3(%arg0: i32, %arg1: i32) -> (i32, i32, i32) {
    %c0_i32 = arith.constant 0 : i32
    %c0_i32_0 = arith.constant 0 : i32
    return %arg0, %arg1, %c0_i32 : i32, i32, i32
  }
}

</mosaic_0001>

<bundles_post_ra>
// kernel: cross_embed_forward.1
= control target key start
LH: loop header
LB: loop body
LE: loop exit
PB: predicated region body
PF: predicated region fallthrough
CT: control target
= control target key end

     0   :  { %s1176_s12 = smov 0   ;;  %s1178_s13 = smov 0   ;;  %s1307_s0 = inlined_call_operand.vmem [shape: bf16[2,80,64], index: 0, kind: input, shape index: {}]   ;;  %s1308_s1 = inlined_call_operand.vmem [shape: bf16[4,64,128], index: 1, kind: input, shape index: {}]   ;;  %s1309_s2 = inlined_call_operand.vmem [shape: f32[1,128], index: 2, kind: input, shape index: {}]   ;;  %s1310_s3 = inlined_call_operand.vmem [shape: f32[2,56,128], index: 3, kind: output, shape index: {}]  }
   0x1   :  { %s1180_s14 = smov 0  }
   0x2 LB: > { %s25_s15 = sadd.s32 1, %s1150_s13  ;;  %p879_p0 = scmp.ge.s32.totalorder %s1154_s14, 1  ;;  %s1154_s14 = sphi %s1180_s14, %s13_s14   ;;  %s1150_s13 = sphi %s1178_s13, %s1312_s13   ;;  %s1146_s12 = sphi %s1176_s12, %s1311_s12  }
   0x3   : > { %p27_p1 = scmp.ge.s32.totalorder %s25_s15, 2  ;;  %p151_p2 = scmp.lt.s32.totalorder %s1154_s14, 3 }
   0x5   : > { %s1314_s15 = smov (%p27_p1, %s25_s15), 0  ;;  %p152_p3 = pnand %p879_p0, %p151_p2 }
   0x6   : > { %p179_p4 = scmp.lt.s32.totalorder (!%p152_p3), %s1146_s12, 1 }
   0x7   : > { %155 = sbr.rel (%p152_p3) target bundleno = 259 (0x103), region = 32 }
   0xc   : > { %v1100_v0 = vld [vmem:[%s1308_s1 + $0x38] sm:$0xff]   ;;  %v1102_v2 = vld [vmem:[%s1308_s1 + $0x30] sm:$0xff]   ;;  %s1316_s12 = smov (!%p179_p4, %s1146_s12), 1  ;;  %v1104_v4 = vld [vmem:[%s1308_s1 + $0x28] sm:$0xff]   ;;  %vm278_vm0 = vcmask 523264  }
   0xd   : > { %v1101_v1 = vld [vmem:[%s1308_s1 + $0x18] sm:$0xff]   ;;  %1010 = vmatprep.subr.bf16.mxu0 %v1100_v0  ;;  %v1103_v3 = vld [vmem:[%s1308_s1 + $0x10] sm:$0xff]   ;;  %s1074_s26 = smul.u32 40, %s1316_s12  ;;  %v1105_v5 = vld [vmem:[%s1308_s1 + $0x8] sm:$0xff]  }
   0xe   : > { %1026 = vmatprep.subr.bf16.mxu1 %v1101_v1  ;;  %1011 = vmatpush3.bf16.msra.mxu0 %v1100_v0  ;;  %v1106_v6 = vld [vmem:[%s1308_s1 + $0x20] sm:$0xff]   ;;  %v1112_v11 = vld [vmem:[%s1308_s1 + $0x58] sm:$0xff]   ;;  %v1114_v14 = vld [vmem:[%s1308_s1 + $0x50] sm:$0xff]   ;;  %s1075_s29 = smul.u32 56, %s1316_s12 }
   0xf   : > { %1027 = vmatpush3.bf16.msra.mxu1 %v1101_v1  ;;  %1012 = vmatprep.subr.bf16.mxu0 %v1102_v2  ;;  %s1221_s6 = scalar_lea.vmem %s1307_s0, %s1074_s26  ;;  %v1107_v7 = vld [vmem:[%s1308_s1] sm:$0xff]   ;;  %v1113_v12 = vld [vmem:[%s1308_s1 + $0x78] sm:$0xff]   ;;  %v1115_v15 = vld [vmem:[%s1308_s1 + $0x70] sm:$0xff]  }
  0x10   : > { %1028 = vmatprep.subr.bf16.mxu1 %v1103_v3  ;;  %v1108_v8 = vld [vmem:[%s1221_s6 + $0x4] sm:$0xff]   ;;  %v1110_v10 = vld [vmem:[%s1221_s6 + $0xc] sm:$0xff]   ;;  %v1116_v16 = vld [vmem:[%s1221_s6 + $0x14] sm:$0xff]   ;;  %s1289_s7 = scalar_lea.vmem %s1310_s3, %s1075_s29 }
  0x11   : > { %v1109_v9 = vld [vmem:[%s1221_s6] sm:$0xff]   ;;  %1018 = vmatprep.mubr.msk.bf16.mxu0 %vm278_vm0, %v1108_v8  ;;  %v1111_v13 = vld [vmem:[%s1221_s6 + $0x8] sm:$0xff]   ;;  %v1117_v17 = vld [vmem:[%s1221_s6 + $0x10] sm:$0xff]  }
  0x12   : > { %1013 = vmatpush3.bf16.msra.mxu0 %v1102_v2  ;;  %1034 = vmatprep.mubr.msk.bf16.mxu1 %vm278_vm0, %v1109_v9  ;;  %v1118_v18 = vld [vmem:[%s1221_s6 + $0x1c] ss:$0 sps:$4 sm:$0xff]   ;;  %v1120_v19 = vld [vmem:[%s1308_s1 + $0x48] sm:$0xff]   ;;  %v1119_v21 = vld [vmem:[%s1221_s6 + $0x18] ss:$0 sps:$4 sm:$0xff]  }
  0x13   : > { %1029 = vmatpush3.bf16.msra.mxu1 %v1103_v3  ;;  %1014 = vmatprep.subr.bf16.mxu0 %v1104_v4  ;;  %v1121_v20 = vld [vmem:[%s1308_s1 + $0x68] sm:$0xff]   ;;  %v1122_v22 = vld [vmem:[%s1308_s1 + $0x40] sm:$0xff]   ;;  %v1126_v26 = vld [vmem:[%s1221_s6 + $0x10] sm:$0xff]  }
  0x14   : > { %1030 = vmatprep.subr.bf16.mxu1 %v1105_v5  ;;  %v1123_v23 = vld [vmem:[%s1308_s1 + $0x60] sm:$0xff]   ;;  %v1124_v24 = vld [vmem:[%s1221_s6 + $0x8] sm:$0xff]   ;;  %v1127_v27 = vld [vmem:[%s1221_s6 + $0x14] sm:$0xff]  }
  0x15   : > { %v1125_v25 = vld [vmem:[%s1221_s6 + $0xc] sm:$0xff]   ;;  %v1128_v28 = vld [vmem:[%s1221_s6 + $0x18] sm:$0xff]   ;;  %v1130_v30 = vld [vmem:[%s1221_s6 + $0x20] ss:$0 sps:$4 sm:$0xff]  }
  0x16   : > { %1015 = vmatpush3.bf16.msra.mxu0 %v1104_v4  ;;  %v1129_v29 = vld [vmem:[%s1221_s6 + $0x1c] sm:$0xff]   ;;  %v1131_v31 = vld [vmem:[%s1221_s6 + $0x24] ss:$0 sps:$4 sm:$0xff]  }
  0x17   : > { %1031 = vmatpush3.bf16.msra.mxu1 %v1105_v5  ;;  %1016 = vmatprep.subr.bf16.mxu0 %v1106_v6  ;;  %v975_v53 = vld [vmem:[%s1309_s2] ss:$0 sm:$0xff] }
  0x18   : > { %1032 = vmatprep.subr.bf16.mxu1 %v1107_v7 }
  0x1a   : > { %1017 = vmatpush3.bf16.msra.mxu0 %v1106_v6 }
  0x1b   : > { %1033 = vmatpush3.bf16.msra.mxu1 %v1107_v7  ;;  %1042 = vmatprep.subr.bf16.mxu0 %v1112_v11 }
  0x1c   : > { %1058 = vmatprep.subr.bf16.mxu1 %v1113_v12 }
  0x1d   : > { %1019 = vmatmul.mubr.msk.bf16.vlgmr.msra.gmra.mxu0 %vm278_vm0, %v1110_v10 }
  0x1e   : > { %1035 = vmatmul.mubr.msk.bf16.vlgmr.msra.gmra.mxu1 %vm278_vm0, %v1111_v13  ;;  %1043 = vmatpush3.bf16.msra.mxu0 %v1112_v11 }
  0x1f   : > { %1059 = vmatpush3.bf16.msra.mxu1 %v1113_v12  ;;  %1044 = vmatprep.subr.bf16.mxu0 %v1114_v14 }
  0x20   : > { %1060 = vmatprep.subr.bf16.mxu1 %v1115_v15  ;;  %1022 = vmatprep.mubr.msk.bf16.mxu0 %vm278_vm0, %v1116_v16 }
  0x21   : > { %1038 = vmatprep.mubr.msk.bf16.mxu1 %vm278_vm0, %v1117_v17 }
  0x22   : > { %1045 = vmatpush3.bf16.msra.mxu0 %v1114_v14 }
  0x23   : > { %1061 = vmatpush3.bf16.msra.mxu1 %v1115_v15  ;;  %1046 = vmatprep.subr.bf16.mxu0 %v1120_v19 }
  0x24   : > { %1062 = vmatprep.subr.bf16.mxu1 %v1121_v20 }
  0x25   : > { %1023 = vmatmul.mubr.msk.bf16.gmra.mxu0 %vm278_vm0, %v1118_v18 }
  0x26   : > { %1039 = vmatmul.mubr.msk.bf16.gmra.mxu1 %vm278_vm0, %v1119_v21  ;;  %1047 = vmatpush3.bf16.msra.mxu0 %v1120_v19 }
  0x27   : > { %1063 = vmatpush3.bf16.msra.mxu1 %v1121_v20  ;;  %1048 = vmatprep.subr.bf16.mxu0 %v1122_v22 }
  0x28   : > { %1064 = vmatprep.subr.bf16.mxu1 %v1123_v23  ;;  %1050 = vmatprep.mubr.msk.bf16.mxu0 %vm278_vm0, %v1124_v24 }
  0x29   : > { %1066 = vmatprep.mubr.msk.bf16.mxu1 %vm278_vm0, %v1125_v25 }
  0x2a   : > { %1049 = vmatpush3.bf16.msra.mxu0 %v1122_v22 }
  0x2b   : > { %1065 = vmatpush3.bf16.msra.mxu1 %v1123_v23 }
  0x2d   : > { %1051 = vmatmul.mubr.msk.bf16.vlgmr.msra.gmra.mxu0 %vm278_vm0, %v1126_v26 }
  0x2e   : > { %1067 = vmatmul.mubr.msk.bf16.vlgmr.msra.gmra.mxu1 %vm278_vm0, %v1127_v27  ;;  %1054 = vmatprep.mubr.msk.bf16.mxu0 %vm278_vm0, %v1128_v28 }
  0x2f   : > { %1070 = vmatprep.mubr.msk.bf16.mxu1 %vm278_vm0, %v1129_v29 }
  0x35   : > { %1055 = vmatmul.mubr.msk.bf16.gmra.mxu0 %vm278_vm0, %v1130_v30 }
  0x36   : > { %1071 = vmatmul.mubr.msk.bf16.gmra.mxu1 %vm278_vm0, %v1131_v31 }
  0xdd   : > { %v1020_v32 = vpop.f32.mrf.mxu0 }
  0xde   : > { %v1036_v33 = vpop.f32.mrf.mxu1 }
  0xdf   : > { %v325_v34 = vpop.f32.mrf.mxu0  ;;  %v452_v47 = vadd.f32 %v1036_v33, %v1020_v32 }
  0xe0   : > { %v443_v35 = vpop.f32.mrf.mxu1 }
  0xe1   : > { %v1021_v36 = vpop.f32.mrf.mxu0  ;;  %v444_v50 = vadd.f32 %v443_v35, %v325_v34 }
  0xe2   : > { %v1037_v37 = vpop.f32.mrf.mxu1 }
  0xe3   : > { %v328_v38 = vpop.f32.mrf.mxu0  ;;  %v455_v55 = vadd.f32 %v1037_v37, %v1021_v36 }
  0xe4   : > { %v446_v39 = vpop.f32.mrf.mxu1 }
  0xe5   : > { %v1024_v40 = vpop.f32.mrf.mxu0  ;;  %v447_v60 = vadd.f32 %v446_v39, %v328_v38 }
  0xe6   : > { %v1040_v41 = vpop.f32.mrf.mxu1 }
  0xe7   : > { %v341_v42 = vpop.f32.mrf.mxu0  ;;  %v468_v2 = vadd.f32 %v1040_v41, %v1024_v40 }
  0xe8   : > { %v459_v43 = vpop.f32.mrf.mxu1 }
  0xe9   : > { %v1025_v44 = vpop.f32.mrf.mxu0  ;;  %v460_v8 = vadd.f32 %v459_v43, %v341_v42 }
  0xea   : > { %v1041_v45 = vpop.f32.mrf.mxu1 }
  0xeb   : > { %v344_v46 = vpop.f32.mrf.mxu0 }
  0xec   : > { %v462_v48 = vpop.f32.mrf.mxu1 }
  0xed   : > { %v1052_v49 = vpop.f32.mrf.mxu0  ;;  %v463_v19 = vadd.f32 %v462_v48, %v344_v46 }
  0xee   : > { %v614_v51 = vadd.f32 %v1052_v49, %v452_v47  ;;  %v1068_v52 = vpop.f32.mrf.mxu1 }
  0xef   : > { %v582_v54 = vpop.f32.mrf.mxu0 }
  0xf0   : > { %v760_v56 = vadd.f32 %v1068_v52, %v614_v51  ;;  %v612_v57 = vadd.f32 %v582_v54, %v444_v50  ;;  %v728_v58 = vpop.f32.mrf.mxu1 }
  0xf1   : > { %v1053_v59 = vpop.f32.mrf.mxu0 }
  0xf2   : > { %v774_v61 = vadd.f32 %v975_v53, %v760_v56  ;;  %v758_v62 = vadd.f32 %v728_v58, %v612_v57  ;;  %v615_v63 = vadd.f32 %v1053_v59, %v455_v55  ;;  %v1069_v0 = vpop.f32.mrf.mxu1 }
  0xf3   : > { %v585_v1 = vpop.f32.mrf.mxu0 }
  0xf4   : > { %781 = vst [vmem:[%s1289_s7 + $0x10] sm:$0xff] %v774_v61  ;;  %v772_v3 = vadd.f32 %v975_v53, %v758_v62  ;;  %v761_v4 = vadd.f32 %v1069_v0, %v615_v63  ;;  %v613_v5 = vadd.f32 %v585_v1, %v447_v60  ;;  %v731_v6 = vpop.f32.mrf.mxu1 }
  0xf5   : > { %v1056_v7 = vpop.f32.mrf.mxu0 }
  0xf6   : > { %779 = vst [vmem:[%s1289_s7] sm:$0xff] %v772_v3  ;;  %v775_v9 = vadd.f32 %v975_v53, %v761_v4  ;;  %v759_v10 = vadd.f32 %v731_v6, %v613_v5  ;;  %v618_v11 = vadd.f32 %v1056_v7, %v468_v2  ;;  %v1072_v12 = vpop.f32.mrf.mxu1 }
  0xf7   : > { %v598_v13 = vpop.f32.mrf.mxu0 }
  0xf8   : > { %782 = vst [vmem:[%s1289_s7 + $0x18] sm:$0xff] %v775_v9  ;;  %v773_v14 = vadd.f32 %v975_v53, %v759_v10  ;;  %v764_v15 = vadd.f32 %v1072_v12, %v618_v11  ;;  %v616_v16 = vadd.f32 %v598_v13, %v460_v8  ;;  %v744_v17 = vpop.f32.mrf.mxu1 }
  0xf9   : > { %v1057_v18 = vpop.f32.mrf.mxu0 }
  0xfa   : > { %780 = vst [vmem:[%s1289_s7 + $0x8] sm:$0xff] %v773_v14  ;;  %v778_v20 = vadd.f32 %v975_v53, %v764_v15  ;;  %v762_v21 = vadd.f32 %v744_v17, %v616_v16  ;;  %v1073_v22 = vpop.f32.mrf.mxu1 }
  0xfb   : > { %v601_v23 = vpop.f32.mrf.mxu0 }
  0xfc   : > { %785 = vst [vmem:[%s1289_s7 + $0x30] sm:$0xff] %v778_v20  ;;  %v776_v24 = vadd.f32 %v975_v53, %v762_v21  ;;  %v617_v25 = vadd.f32 %v601_v23, %v463_v19  ;;  %v747_v26 = vpop.f32.mrf.mxu1 }
  0xfe   : > { %783 = vst [vmem:[%s1289_s7 + $0x20] sm:$0xff] %v776_v24  ;;  %v763_v27 = vadd.f32 %v747_v26, %v617_v25 }
 0x100   : > { %v777_v28 = vadd.f32 %v975_v53, %v763_v27 }
 0x102   : > { %784 = vst [vmem:[%s1289_s7 + $0x28] sm:$0xff] %v777_v28 }
 0x103 PF: > { %s13_s14 = sadd.s32 1, %s1154_s14   ;;  %s1311_s12 = smov %s1150_s13 }
 0x104   : > { %p10_p5 = scmp.ge.s32.totalorder %s13_s14, 4   ;;  %s1312_s13 = smov %s1314_s15 }
 0x106   :  { %12 = sbr.rel (!%p10_p5) target bundleno = 2 (0x2), region = 69 }

</bundles_post_ra>
